<compile_context>
chip_gen: v7x
topology: tpu7x:2x2x1
jax: 0.10.0
libtpu: 0.0.40
codegen_flags: <defaults>
</compile_context>

<pallas_src>
import functools

import jax
import jax.numpy as jnp
from jax.experimental import pallas as pl
from jax.experimental.pallas import tpu as pltpu


def _bmc_tile_kernel(neg_inv_ref, pred_ref, tgt_ref, tgt_t_ref, out_ref, *,
                     n_target, batch, tile_rows):
    neg_inv = neg_inv_ref[0, 0]                      # = -1 / (2 * noise_var)

    pred = pred_ref[...]                             # [TILE_R, T] f32
    tgt = tgt_ref[...]                               # [TILE_R, T] f32
    tgt_t = tgt_t_ref[...]                           # [T, B]      f32 (lane-dense)

    # Valid-row mask for the (possibly padded) last row tile.
    row0 = pl.program_id(0) * tile_rows
    rows = jax.lax.broadcasted_iota(jnp.int32, (tile_rows, 1), 0) + row0
    valid = rows < batch                             # [TILE_R, 1] bool

    # Diagonal term logits[a, a] for every target, straight from the inputs.
    d = pred - tgt
    diag = d * d * neg_inv                           # [TILE_R, T]
    diag_sum = jnp.sum(
        jnp.where(valid, jnp.sum(diag, axis=-1, keepdims=True), 0.0))

    # Row-wise logsumexp over the [TILE_R, B] pairwise-logits slab, per target.
    lse_sum = jnp.float32(0.0)
    for i in range(n_target):                        # static unroll (T is small)
        diff = pred[:, i:i + 1] - tgt_t[i:i + 1, :]  # [TILE_R, B] broadcast
        logits = diff * diff * neg_inv
        m = jnp.max(logits, axis=-1, keepdims=True)
        lse = m + jnp.log(jnp.sum(jnp.exp(logits - m), axis=-1, keepdims=True))
        lse_sum = lse_sum + jnp.sum(jnp.where(valid, lse, 0.0))

    # Per-tile partial sum of (lse - diag); one independent (8,128)-aligned block
    # per grid step so the row-tile axis can be "parallel".
    out_ref[...] = jnp.full((1, 8, 128), lse_sum - diag_sum, dtype=jnp.float32)


def multi_target_bmc_loss(pred, target, noise_sigma, *, tile_rows=None):
    """pred, target: [batch, n_target] float; noise_sigma: scalar parameter."""
    pred = pred.astype(jnp.float32)
    target = target.astype(jnp.float32)
    b, t = pred.shape

    noise_var = jnp.asarray(noise_sigma, dtype=jnp.float32) ** 2
    two_nv = 2.0 * noise_var
    neg_inv = jnp.reshape(-1.0 / two_nv, (1, 1))     # hoisted scalar, lives in SMEM

    if tile_rows is None:
        # v5e/v6e-sized default; re-derive per generation (~256 on v7x, 64 MiB VMEM).
        tile_rows = 512
    if b <= tile_rows:
        tile_rows = b          # full-extent block (exempt from the 8-row rule)
    else:
        tile_rows = max(8, (tile_rows // 8) * 8)
    num_tiles = pl.cdiv(b, tile_rows)

    target_t = target.T        # [T, B] lane-dense broadcast operand (XLA transpose)

    kernel = functools.partial(_bmc_tile_kernel, n_target=t, batch=b,
                               tile_rows=tile_rows)
    partials = pl.pallas_call(
        kernel,
        out_shape=jax.ShapeDtypeStruct((num_tiles, 8, 128), jnp.float32),
        grid=(num_tiles,),
        in_specs=[
            pl.BlockSpec(memory_space=pltpu.MemorySpace.SMEM),     # -1/(2*nv)
            pl.BlockSpec((tile_rows, t), lambda i: (i, 0)),        # pred row tile
            pl.BlockSpec((tile_rows, t), lambda i: (i, 0)),        # target row tile
            pl.BlockSpec((t, b), lambda i: (0, 0)),                # target^T resident
        ],
        out_specs=pl.BlockSpec((1, 8, 128), lambda i: (i, 0, 0)),
        compiler_params=pltpu.CompilerParams(
            dimension_semantics=("parallel",)),
    )(neg_inv, pred, target, target_t)

    grand = jnp.sum(partials[:, 0, 0])
    # Fold the per-target mean, the (2*noise_var) scale and the /6 into one mul.
    # NOTE: /6 is hard-coded in the PyTorch module regardless of n_target.
    return grand * two_nv / (b * 6.0)


def _reference(pred, target, noise_sigma):
    """Pure-JAX reference mirroring the PyTorch forward."""
    nv = jnp.asarray(noise_sigma, jnp.float32) ** 2
    b, t = pred.shape
    total = jnp.float32(0.0)
    for i in range(t):
        p = pred[:, i:i + 1]
        tg = target[:, i:i + 1]
        logits = -((p - tg.T) ** 2) / (2 * nv)
        logp = jax.nn.log_softmax(logits, axis=-1)
        ce = -jnp.mean(jnp.diagonal(logp))
        total = total + ce * 2 * nv
    return total / 6.0


if __name__ == "__main__":
    init_noise_sigma = jnp.float32(0.75)

    key = jax.random.PRNGKey(0)
    k_pred, k_tgt, k_pred2, k_tgt2 = jax.random.split(key, 4)

    # Small shape consistent with the module's /6 (n_target = 6).
    batch, n_target = 8, 6
    pred = jax.random.normal(k_pred, (batch, n_target), dtype=jnp.float32)
    target = jax.random.normal(k_tgt, (batch, n_target), dtype=jnp.float32)

    loss = jax.block_until_ready(multi_target_bmc_loss(pred, target, init_noise_sigma))
    ref = _reference(pred, target, init_noise_sigma)
    assert jnp.allclose(loss, ref, rtol=1e-5, atol=1e-5), (loss, ref)

    # Second check exercising the row-tile grid + padded-last-tile masking.
    batch2 = 200  # not a multiple of the tile size
    pred2 = jax.random.normal(k_pred2, (batch2, n_target), dtype=jnp.float32)
    target2 = jax.random.normal(k_tgt2, (batch2, n_target), dtype=jnp.float32)
    loss2 = jax.block_until_ready(
        multi_target_bmc_loss(pred2, target2, init_noise_sigma, tile_rows=64))
    ref2 = _reference(pred2, target2, init_noise_sigma)
    assert jnp.allclose(loss2, ref2, rtol=1e-5, atol=1e-5), (loss2, ref2)

    print("KERNEL_OK")
</pallas_src>

<mosaic_0001>
module attributes {stable_mosaic.version = 11 : i64} {
  func.func @_bmc_tile_kernel(%arg0: i32, %arg1: memref<1x1xf32, #tpu.memory_space<smem>>, %arg2: memref<8x6xf32, #tpu.memory_space<vmem>>, %arg3: memref<8x6xf32, #tpu.memory_space<vmem>>, %arg4: memref<6x8xf32, #tpu.memory_space<vmem>>, %arg5: memref<1x8x128xf32, #tpu.memory_space<vmem>>) attributes {dimension_semantics = [#tpu.dimension_semantics<parallel>], iteration_bounds = array<i64: 1>, scalar_prefetch = 0 : i64, scratch_operands = 0 : i64, tpu.core_type = #tpu.core_type<tc>, window_params = [{transform_indices = @transform_0, window_bounds = array<i64: 1, 1>}, {transform_indices = @transform_1, window_bounds = array<i64: 8, 6>}, {transform_indices = @transform_2, window_bounds = array<i64: 8, 6>}, {pipeline_mode = #tpu.pipeline_mode<synchronous>, transform_indices = @transform_3, window_bounds = array<i64: 6, 8>}, {transform_indices = @transform_4, window_bounds = array<i64: 1, 8, 128>}]} {
    %c0 = arith.constant 0 : index
    %c0_0 = arith.constant 0 : index
    %0 = memref.load %arg1[%c0, %c0_0] : memref<1x1xf32, #tpu.memory_space<smem>>
    %c0_1 = arith.constant 0 : index
    %c0_2 = arith.constant 0 : index
    %1 = vector.load %arg2[%c0_1, %c0_2] : memref<8x6xf32, #tpu.memory_space<vmem>>, vector<8x6xf32>
    %c0_3 = arith.constant 0 : index
    %c0_4 = arith.constant 0 : index
    %2 = vector.load %arg3[%c0_3, %c0_4] : memref<8x6xf32, #tpu.memory_space<vmem>>, vector<8x6xf32>
    %c0_5 = arith.constant 0 : index
    %c0_6 = arith.constant 0 : index
    %3 = vector.load %arg4[%c0_5, %c0_6] : memref<6x8xf32, #tpu.memory_space<vmem>>, vector<6x8xf32>
    %c8_i32 = arith.constant 8 : i32
    %4 = arith.muli %arg0, %c8_i32 : i32
    %5 = tpu.iota {dimensions = array<i32: 0>} : vector<8x1xi32>
    %6 = vector.broadcast %4 : i32 to vector<8x1xi32>
    %7 = arith.addi %5, %6 : vector<8x1xi32>
    %c8_i32_7 = arith.constant 8 : i32
    %8 = vector.broadcast %c8_i32_7 : i32 to vector<8x1xi32>
    %9 = arith.cmpi slt, %7, %8 : vector<8x1xi32>
    %10 = arith.subf %1, %2 : vector<8x6xf32>
    %11 = arith.mulf %10, %10 : vector<8x6xf32>
    %12 = vector.broadcast %0 : f32 to vector<8x6xf32>
    %13 = arith.mulf %11, %12 : vector<8x6xf32>
    %cst = arith.constant dense<0.000000e+00> : vector<8xf32>
    %14 = vector.multi_reduction <add>, %13, %cst [1] : vector<8x6xf32> to vector<8xf32>
    %15 = vector.shape_cast %14 : vector<8xf32> to vector<8x1xf32>
    %cst_8 = arith.constant 0.000000e+00 : f32
    %16 = vector.broadcast %cst_8 : f32 to vector<8x1xf32>
    %17 = arith.select %9, %15, %16 : vector<8x1xi1>, vector<8x1xf32>
    %18 = vector.shape_cast %17 : vector<8x1xf32> to vector<1x8x1xf32>
    %cst_9 = arith.constant dense<0.000000e+00> : vector<1xf32>
    %19 = vector.multi_reduction <add>, %18, %cst_9 [1, 2] : vector<1x8x1xf32> to vector<1xf32>
    %20 = vector.shape_cast %19 : vector<1xf32> to vector<1x1x1xf32>
    %21 = vector.extract %20[0, 0, 0] : f32 from vector<1x1x1xf32>
    %22 = vector.extract_strided_slice %1 {offsets = [0, 0], sizes = [8, 1], strides = [1, 1]} : vector<8x6xf32> to vector<8x1xf32>
    %23 = vector.extract_strided_slice %3 {offsets = [0, 0], sizes = [1, 8], strides = [1, 1]} : vector<6x8xf32> to vector<1x8xf32>
    %24 = vector.broadcast %22 : vector<8x1xf32> to vector<8x8xf32>
    %25 = vector.broadcast %23 : vector<1x8xf32> to vector<8x8xf32>
    %26 = arith.subf %24, %25 : vector<8x8xf32>
    %27 = arith.mulf %26, %26 : vector<8x8xf32>
    %28 = vector.broadcast %0 : f32 to vector<8x8xf32>
    %29 = arith.mulf %27, %28 : vector<8x8xf32>
    %cst_10 = arith.constant dense<0xFF800000> : vector<8xf32>
    %30 = vector.multi_reduction <maximumf>, %29, %cst_10 [1] : vector<8x8xf32> to vector<8xf32>
    %31 = vector.shape_cast %30 : vector<8xf32> to vector<8x1xf32>
    %32 = vector.broadcast %31 : vector<8x1xf32> to vector<8x8xf32>
    %33 = arith.subf %29, %32 : vector<8x8xf32>
    %34 = math.exp %33 : vector<8x8xf32>
    %cst_11 = arith.constant dense<0.000000e+00> : vector<8xf32>
    %35 = vector.multi_reduction <add>, %34, %cst_11 [1] : vector<8x8xf32> to vector<8xf32>
    %36 = vector.shape_cast %35 : vector<8xf32> to vector<8x1xf32>
    %37 = math.log %36 : vector<8x1xf32>
    %38 = arith.addf %31, %37 : vector<8x1xf32>
    %cst_12 = arith.constant 0.000000e+00 : f32
    %39 = vector.broadcast %cst_12 : f32 to vector<8x1xf32>
    %40 = arith.select %9, %38, %39 : vector<8x1xi1>, vector<8x1xf32>
    %41 = vector.shape_cast %40 : vector<8x1xf32> to vector<1x8x1xf32>
    %cst_13 = arith.constant dense<0.000000e+00> : vector<1xf32>
    %42 = vector.multi_reduction <add>, %41, %cst_13 [1, 2] : vector<1x8x1xf32> to vector<1xf32>
    %43 = vector.shape_cast %42 : vector<1xf32> to vector<1x1x1xf32>
    %44 = vector.extract %43[0, 0, 0] : f32 from vector<1x1x1xf32>
    %cst_14 = arith.constant 0.000000e+00 : f32
    %45 = arith.addf %cst_14, %44 : f32
    %46 = vector.extract_strided_slice %1 {offsets = [0, 1], sizes = [8, 1], strides = [1, 1]} : vector<8x6xf32> to vector<8x1xf32>
    %47 = vector.extract_strided_slice %3 {offsets = [1, 0], sizes = [1, 8], strides = [1, 1]} : vector<6x8xf32> to vector<1x8xf32>
    %48 = vector.broadcast %46 : vector<8x1xf32> to vector<8x8xf32>
    %49 = vector.broadcast %47 : vector<1x8xf32> to vector<8x8xf32>
    %50 = arith.subf %48, %49 : vector<8x8xf32>
    %51 = arith.mulf %50, %50 : vector<8x8xf32>
    %52 = vector.broadcast %0 : f32 to vector<8x8xf32>
    %53 = arith.mulf %51, %52 : vector<8x8xf32>
    %cst_15 = arith.constant dense<0xFF800000> : vector<8xf32>
    %54 = vector.multi_reduction <maximumf>, %53, %cst_15 [1] : vector<8x8xf32> to vector<8xf32>
    %55 = vector.shape_cast %54 : vector<8xf32> to vector<8x1xf32>
    %56 = vector.broadcast %55 : vector<8x1xf32> to vector<8x8xf32>
    %57 = arith.subf %53, %56 : vector<8x8xf32>
    %58 = math.exp %57 : vector<8x8xf32>
    %cst_16 = arith.constant dense<0.000000e+00> : vector<8xf32>
    %59 = vector.multi_reduction <add>, %58, %cst_16 [1] : vector<8x8xf32> to vector<8xf32>
    %60 = vector.shape_cast %59 : vector<8xf32> to vector<8x1xf32>
    %61 = math.log %60 : vector<8x1xf32>
    %62 = arith.addf %55, %61 : vector<8x1xf32>
    %cst_17 = arith.constant 0.000000e+00 : f32
    %63 = vector.broadcast %cst_17 : f32 to vector<8x1xf32>
    %64 = arith.select %9, %62, %63 : vector<8x1xi1>, vector<8x1xf32>
    %65 = vector.shape_cast %64 : vector<8x1xf32> to vector<1x8x1xf32>
    %cst_18 = arith.constant dense<0.000000e+00> : vector<1xf32>
    %66 = vector.multi_reduction <add>, %65, %cst_18 [1, 2] : vector<1x8x1xf32> to vector<1xf32>
    %67 = vector.shape_cast %66 : vector<1xf32> to vector<1x1x1xf32>
    %68 = vector.extract %67[0, 0, 0] : f32 from vector<1x1x1xf32>
    %69 = arith.addf %45, %68 : f32
    %70 = vector.extract_strided_slice %1 {offsets = [0, 2], sizes = [8, 1], strides = [1, 1]} : vector<8x6xf32> to vector<8x1xf32>
    %71 = vector.extract_strided_slice %3 {offsets = [2, 0], sizes = [1, 8], strides = [1, 1]} : vector<6x8xf32> to vector<1x8xf32>
    %72 = vector.broadcast %70 : vector<8x1xf32> to vector<8x8xf32>
    %73 = vector.broadcast %71 : vector<1x8xf32> to vector<8x8xf32>
    %74 = arith.subf %72, %73 : vector<8x8xf32>
    %75 = arith.mulf %74, %74 : vector<8x8xf32>
    %76 = vector.broadcast %0 : f32 to vector<8x8xf32>
    %77 = arith.mulf %75, %76 : vector<8x8xf32>
    %cst_19 = arith.constant dense<0xFF800000> : vector<8xf32>
    %78 = vector.multi_reduction <maximumf>, %77, %cst_19 [1] : vector<8x8xf32> to vector<8xf32>
    %79 = vector.shape_cast %78 : vector<8xf32> to vector<8x1xf32>
    %80 = vector.broadcast %79 : vector<8x1xf32> to vector<8x8xf32>
    %81 = arith.subf %77, %80 : vector<8x8xf32>
    %82 = math.exp %81 : vector<8x8xf32>
    %cst_20 = arith.constant dense<0.000000e+00> : vector<8xf32>
    %83 = vector.multi_reduction <add>, %82, %cst_20 [1] : vector<8x8xf32> to vector<8xf32>
    %84 = vector.shape_cast %83 : vector<8xf32> to vector<8x1xf32>
    %85 = math.log %84 : vector<8x1xf32>
    %86 = arith.addf %79, %85 : vector<8x1xf32>
    %cst_21 = arith.constant 0.000000e+00 : f32
    %87 = vector.broadcast %cst_21 : f32 to vector<8x1xf32>
    %88 = arith.select %9, %86, %87 : vector<8x1xi1>, vector<8x1xf32>
    %89 = vector.shape_cast %88 : vector<8x1xf32> to vector<1x8x1xf32>
    %cst_22 = arith.constant dense<0.000000e+00> : vector<1xf32>
    %90 = vector.multi_reduction <add>, %89, %cst_22 [1, 2] : vector<1x8x1xf32> to vector<1xf32>
    %91 = vector.shape_cast %90 : vector<1xf32> to vector<1x1x1xf32>
    %92 = vector.extract %91[0, 0, 0] : f32 from vector<1x1x1xf32>
    %93 = arith.addf %69, %92 : f32
    %94 = vector.extract_strided_slice %1 {offsets = [0, 3], sizes = [8, 1], strides = [1, 1]} : vector<8x6xf32> to vector<8x1xf32>
    %95 = vector.extract_strided_slice %3 {offsets = [3, 0], sizes = [1, 8], strides = [1, 1]} : vector<6x8xf32> to vector<1x8xf32>
    %96 = vector.broadcast %94 : vector<8x1xf32> to vector<8x8xf32>
    %97 = vector.broadcast %95 : vector<1x8xf32> to vector<8x8xf32>
    %98 = arith.subf %96, %97 : vector<8x8xf32>
    %99 = arith.mulf %98, %98 : vector<8x8xf32>
    %100 = vector.broadcast %0 : f32 to vector<8x8xf32>
    %101 = arith.mulf %99, %100 : vector<8x8xf32>
    %cst_23 = arith.constant dense<0xFF800000> : vector<8xf32>
    %102 = vector.multi_reduction <maximumf>, %101, %cst_23 [1] : vector<8x8xf32> to vector<8xf32>
    %103 = vector.shape_cast %102 : vector<8xf32> to vector<8x1xf32>
    %104 = vector.broadcast %103 : vector<8x1xf32> to vector<8x8xf32>
    %105 = arith.subf %101, %104 : vector<8x8xf32>
    %106 = math.exp %105 : vector<8x8xf32>
    %cst_24 = arith.constant dense<0.000000e+00> : vector<8xf32>
    %107 = vector.multi_reduction <add>, %106, %cst_24 [1] : vector<8x8xf32> to vector<8xf32>
    %108 = vector.shape_cast %107 : vector<8xf32> to vector<8x1xf32>
    %109 = math.log %108 : vector<8x1xf32>
    %110 = arith.addf %103, %109 : vector<8x1xf32>
    %cst_25 = arith.constant 0.000000e+00 : f32
    %111 = vector.broadcast %cst_25 : f32 to vector<8x1xf32>
    %112 = arith.select %9, %110, %111 : vector<8x1xi1>, vector<8x1xf32>
    %113 = vector.shape_cast %112 : vector<8x1xf32> to vector<1x8x1xf32>
    %cst_26 = arith.constant dense<0.000000e+00> : vector<1xf32>
    %114 = vector.multi_reduction <add>, %113, %cst_26 [1, 2] : vector<1x8x1xf32> to vector<1xf32>
    %115 = vector.shape_cast %114 : vector<1xf32> to vector<1x1x1xf32>
    %116 = vector.extract %115[0, 0, 0] : f32 from vector<1x1x1xf32>
    %117 = arith.addf %93, %116 : f32
    %118 = vector.extract_strided_slice %1 {offsets = [0, 4], sizes = [8, 1], strides = [1, 1]} : vector<8x6xf32> to vector<8x1xf32>
    %119 = vector.extract_strided_slice %3 {offsets = [4, 0], sizes = [1, 8], strides = [1, 1]} : vector<6x8xf32> to vector<1x8xf32>
    %120 = vector.broadcast %118 : vector<8x1xf32> to vector<8x8xf32>
    %121 = vector.broadcast %119 : vector<1x8xf32> to vector<8x8xf32>
    %122 = arith.subf %120, %121 : vector<8x8xf32>
    %123 = arith.mulf %122, %122 : vector<8x8xf32>
    %124 = vector.broadcast %0 : f32 to vector<8x8xf32>
    %125 = arith.mulf %123, %124 : vector<8x8xf32>
    %cst_27 = arith.constant dense<0xFF800000> : vector<8xf32>
    %126 = vector.multi_reduction <maximumf>, %125, %cst_27 [1] : vector<8x8xf32> to vector<8xf32>
    %127 = vector.shape_cast %126 : vector<8xf32> to vector<8x1xf32>
    %128 = vector.broadcast %127 : vector<8x1xf32> to vector<8x8xf32>
    %129 = arith.subf %125, %128 : vector<8x8xf32>
    %130 = math.exp %129 : vector<8x8xf32>
    %cst_28 = arith.constant dense<0.000000e+00> : vector<8xf32>
    %131 = vector.multi_reduction <add>, %130, %cst_28 [1] : vector<8x8xf32> to vector<8xf32>
    %132 = vector.shape_cast %131 : vector<8xf32> to vector<8x1xf32>
    %133 = math.log %132 : vector<8x1xf32>
    %134 = arith.addf %127, %133 : vector<8x1xf32>
    %cst_29 = arith.constant 0.000000e+00 : f32
    %135 = vector.broadcast %cst_29 : f32 to vector<8x1xf32>
    %136 = arith.select %9, %134, %135 : vector<8x1xi1>, vector<8x1xf32>
    %137 = vector.shape_cast %136 : vector<8x1xf32> to vector<1x8x1xf32>
    %cst_30 = arith.constant dense<0.000000e+00> : vector<1xf32>
    %138 = vector.multi_reduction <add>, %137, %cst_30 [1, 2] : vector<1x8x1xf32> to vector<1xf32>
    %139 = vector.shape_cast %138 : vector<1xf32> to vector<1x1x1xf32>
    %140 = vector.extract %139[0, 0, 0] : f32 from vector<1x1x1xf32>
    %141 = arith.addf %117, %140 : f32
    %142 = vector.extract_strided_slice %1 {offsets = [0, 5], sizes = [8, 1], strides = [1, 1]} : vector<8x6xf32> to vector<8x1xf32>
    %143 = vector.extract_strided_slice %3 {offsets = [5, 0], sizes = [1, 8], strides = [1, 1]} : vector<6x8xf32> to vector<1x8xf32>
    %144 = vector.broadcast %142 : vector<8x1xf32> to vector<8x8xf32>
    %145 = vector.broadcast %143 : vector<1x8xf32> to vector<8x8xf32>
    %146 = arith.subf %144, %145 : vector<8x8xf32>
    %147 = arith.mulf %146, %146 : vector<8x8xf32>
    %148 = vector.broadcast %0 : f32 to vector<8x8xf32>
    %149 = arith.mulf %147, %148 : vector<8x8xf32>
    %cst_31 = arith.constant dense<0xFF800000> : vector<8xf32>
    %150 = vector.multi_reduction <maximumf>, %149, %cst_31 [1] : vector<8x8xf32> to vector<8xf32>
    %151 = vector.shape_cast %150 : vector<8xf32> to vector<8x1xf32>
    %152 = vector.broadcast %151 : vector<8x1xf32> to vector<8x8xf32>
    %153 = arith.subf %149, %152 : vector<8x8xf32>
    %154 = math.exp %153 : vector<8x8xf32>
    %cst_32 = arith.constant dense<0.000000e+00> : vector<8xf32>
    %155 = vector.multi_reduction <add>, %154, %cst_32 [1] : vector<8x8xf32> to vector<8xf32>
    %156 = vector.shape_cast %155 : vector<8xf32> to vector<8x1xf32>
    %157 = math.log %156 : vector<8x1xf32>
    %158 = arith.addf %151, %157 : vector<8x1xf32>
    %cst_33 = arith.constant 0.000000e+00 : f32
    %159 = vector.broadcast %cst_33 : f32 to vector<8x1xf32>
    %160 = arith.select %9, %158, %159 : vector<8x1xi1>, vector<8x1xf32>
    %161 = vector.shape_cast %160 : vector<8x1xf32> to vector<1x8x1xf32>
    %cst_34 = arith.constant dense<0.000000e+00> : vector<1xf32>
    %162 = vector.multi_reduction <add>, %161, %cst_34 [1, 2] : vector<1x8x1xf32> to vector<1xf32>
    %163 = vector.shape_cast %162 : vector<1xf32> to vector<1x1x1xf32>
    %164 = vector.extract %163[0, 0, 0] : f32 from vector<1x1x1xf32>
    %165 = arith.addf %141, %164 : f32
    %166 = arith.subf %165, %21 : f32
    %167 = vector.broadcast %166 : f32 to vector<1x8x128xf32>
    %c0_35 = arith.constant 0 : index
    %c0_36 = arith.constant 0 : index
    %c0_37 = arith.constant 0 : index
    %168 = vector.load %arg5[%c0_35, %c0_36, %c0_37] : memref<1x8x128xf32, #tpu.memory_space<vmem>>, vector<1x8x128xf32>
    tpu.vector_store %arg5[%c0_35, %c0_36, %c0_37], %167 {strides = array<i32>} : memref<1x8x128xf32, #tpu.memory_space<vmem>>, vector<1x8x128xf32>,
    return
  }
  func.func @transform_0(%arg0: i32) -> (i32, i32) {
    %c0_i32 = arith.constant 0 : i32
    %c0_i32_0 = arith.constant 0 : i32
    %c0_i32_1 = arith.constant 0 : i32
    return %c0_i32, %c0_i32_0 : i32, i32
  }
  func.func @transform_1(%arg0: i32) -> (i32, i32) {
    %c0_i32 = arith.constant 0 : i32
    %c0_i32_0 = arith.constant 0 : i32
    return %arg0, %c0_i32 : i32, i32
  }
  func.func @transform_2(%arg0: i32) -> (i32, i32) {
    %c0_i32 = arith.constant 0 : i32
    %c0_i32_0 = arith.constant 0 : i32
    return %arg0, %c0_i32 : i32, i32
  }
  func.func @transform_3(%arg0: i32) -> (i32, i32) {
    %c0_i32 = arith.constant 0 : i32
    %c0_i32_0 = arith.constant 0 : i32
    %c0_i32_1 = arith.constant 0 : i32
    return %c0_i32, %c0_i32_0 : i32, i32
  }
  func.func @transform_4(%arg0: i32) -> (i32, i32, i32) {
    %c0_i32 = arith.constant 0 : i32
    %c0_i32_0 = arith.constant 0 : i32
    %c0_i32_1 = arith.constant 0 : i32
    return %arg0, %c0_i32, %c0_i32_0 : i32, i32, i32
  }
}

</mosaic_0001>

<bundles_post_ra>
// kernel: tpu_custom_call.1
= control target key start
LH: loop header
LB: loop body
LE: loop exit
PB: predicated region body
PF: predicated region fallthrough
CT: control target
= control target key end

     0   :  { %10 = vsyncpa [#allocation4], 0  ;;  %s566_s0 = inlined_call_operand.<no memory space> [shape: f32[1,1], index: 0, kind: input, shape index: {}]   ;;  %s567_s1 = inlined_call_operand.hbm [shape: f32[8,6], index: 1, kind: input, shape index: {}]   ;;  %s568_s2 = inlined_call_operand.hbm [shape: f32[8,6], index: 2, kind: input, shape index: {}]   ;;  %s569_s3 = inlined_call_operand.vmem [shape: f32[6,8], index: 3, kind: input, shape index: {}]   ;;  %s570_s4 = inlined_call_operand.hbm [shape: f32[1,8,128], index: 4, kind: output, shape index: {}]  }
   0x1   :  { %11 = vsyncpa [#allocation7], 0 }
   0x2   :  { %12 = vsyncpa [#allocation5], 0  ;;  %s429_s15 = smov [#allocation3]   ;;  %s430_s17 = smov [#allocation6]  }
   0x3   :  { %s21_s16 = sshll.u32 %s429_s15, 4  ;;  %s31_s18 = sshll.u32 %s430_s17, 4  ;;  %s22_s16 = int_to_ptr.vmem [resolvable:$true] %s21_s16  ;;  %s32_s18 = int_to_ptr.vmem [resolvable:$true] %s31_s18 }
   0x4   :  { %s357_s21 = scalar_lea.hbm %s567_s1, 128 }
   0x5   :  { %p358_p0 = scmp.ne.s32.totalorder %s567_s1, %s357_s21  ;;  %p361_p1 = scmp.lt.u32.totalorder %s357_s21, %s567_s1 }
   0x7   :  { %p363_p2 = pnand %p361_p1, %p358_p0 }
   0x9   :  { %366 = shalt.err (!%p363_p2)
}
   0xa   :  { %s367_s26 = scalar_lea.vmem %s22_s16, 128  ;;  %p372_p4 = scmp.lt.s32.totalorder %s22_s16, %s22_s16 }
   0xb   :  { %p368_p3 = scmp.ne.s32.totalorder %s22_s16, %s367_s26  ;;  %p373_p5 = scmp.lt.s32.totalorder %s367_s26, %s367_s26 }
   0xd   :  { %p374_p6 = por %p373_p5, %p372_p4 }
   0xf   :  { %p375_p7 = pnand %p374_p6, %p368_p3 }
  0x11   :  { %378 = shalt.err (!%p375_p7)
}
  0x12   :  { %24 = dma.hbm_to_vmem [thread:$0]  %s567_s1, 128, %s22_s16, [#allocation4]  }
  0x13   :  { %s379_s5 = scalar_lea.hbm %s568_s2, 128 }
  0x14   :  { %p380_p8 = scmp.ne.s32.totalorder %s568_s2, %s379_s5  ;;  %p383_p9 = scmp.lt.u32.totalorder %s379_s5, %s568_s2 }
  0x16   :  { %p385_p10 = pnand %p383_p9, %p380_p8 }
  0x18   :  { %388 = shalt.err (!%p385_p10)
}
  0x19   :  { %s389_s10 = scalar_lea.vmem %s32_s18, 128  ;;  %p394_p12 = scmp.lt.s32.totalorder %s32_s18, %s32_s18 }
  0x1a   :  { %p390_p11 = scmp.ne.s32.totalorder %s32_s18, %s389_s10  ;;  %p395_p13 = scmp.lt.s32.totalorder %s389_s10, %s389_s10 }
  0x1c   :  { %p396_p0 = por %p395_p13, %p394_p12 }
  0x1e   :  { %p397_p1 = pnand %p396_p0, %p390_p11 }
  0x20   :  { %400 = shalt.err (!%p397_p1)
}
  0x21   :  { %34 = dma.hbm_to_vmem [thread:$0]  %s568_s2, 128, %s32_s18, [#allocation7]  }
  0x22   :  { %423 = dma.done.wait [#allocation4], 128  }
  0x23   :  { %424 = vsyncadd [#allocation4], 4294967168 }
  0x24   :  { %425 = dma.done.wait [#allocation7], 128  }
  0x25   :  { %426 = vsyncadd [#allocation7], 4294967168  ;;  %v431_v0 = vmov 2   ;;  %v432_v1 = vmov 0   ;;  %v487_v2 = vld [vmem:[#allocation3] sm:$0xff]  ;;  %v433_v3 = vmov 3   ;;  %v78_v7 = vlaneseq }
  0x26   :  { %329 = vset.pattern.permute.xlu1 %v431_v0  ;;  %327 = vset.pattern.permute.xlu0 %v432_v1  ;;  %v434_v4 = vmov 1   ;;  %v435_v5 = vmov 4   ;;  %v436_v6 = vmov 5   ;;  %v46_v11 = vld [vmem:[%s569_s3] sm:$0x3f]  ;;  %v501_v22 = vstv %s566_s0  ;;  %s437_s25 = smov [#allocation8]  }
  0x27   :  { %146 = vperm.xlu1 %329, %v487_v2   ;;  %75 = vperm.xlu0 %327, %v487_v2   ;;  %v79_v8 = vshrl.u32 %v78_v7, 7  ;;  %vm85_vm0 = vcmask 64512   ;;  %vm57_vm1 = vcmask 48128   ;;  %vm62_vm2 = vcmask 7168   ;;  %s294_s26 = sshll.u32 %s437_s25, 4  ;;  %s295_s26 = int_to_ptr.vmem [resolvable:$true] %s294_s26 }
  0x28   :  { %s401_s28 = scalar_lea.vmem %s295_s26, 128  ;;  %p406_p3 = scmp.lt.s32.totalorder %s295_s26, %s295_s26 }
  0x29   :  { %v80_v9 = vsub.s32 0, %v79_v8  ;;  %v151_v10 = vsub.s32 2, %v79_v8  ;;  %v116_v14 = vsub.s32 1, %v79_v8  ;;  %v186_v15 = vsub.s32 3, %v79_v8  ;;  %p402_p2 = scmp.ne.s32.totalorder %s295_s26, %s401_s28  ;;  %p407_p4 = scmp.lt.s32.totalorder %s401_s28, %s401_s28 }
  0x2a   :  { %v221_v25 = vsub.s32 4, %v79_v8  ;;  %v256_v26 = vsub.s32 5, %v79_v8 }
  0x2b   :  { %330 = vset.pattern.permute.xlu1 %v433_v3  ;;  %328 = vset.pattern.permute.xlu0 %v434_v4  ;;  %v81_v12 = vrot.slane %v46_v11, %v80_v9  ;;  %v152_v13 = vrot.slane %v46_v11, %v151_v10  ;;  %v117_v20 = vrot.slane %v46_v11, %v116_v14  ;;  %p408_p5 = por %p407_p4, %p406_p3 }
  0x2c   :  { %181 = vperm.xlu1 %330, %v487_v2   ;;  %111 = vperm.xlu0 %328, %v487_v2   ;;  %v187_v21 = vrot.slane %v46_v11, %v186_v15  ;;  %v222_v33 = vrot.slane %v46_v11, %v221_v25  ;;  %v257_v35 = vrot.slane %v46_v11, %v256_v26 }
  0x2d   :  { %p409_p6 = pnand %p408_p5, %p402_p2 }
  0x30   :  { %331 = vset.pattern.permute.xlu1 %v435_v5  ;;  %332 = vset.pattern.permute.xlu0 %v436_v6  ;;  %v45_v6 = vld [vmem:[#allocation6] sm:$0xff] }
  0x31   :  { %216 = vperm.xlu1 %331, %v487_v2   ;;  %251 = vperm.xlu0 %332, %v487_v2   ;;  %v53_v11 = vsub.f32 %v487_v2, %v45_v6 }
  0x33   :  { %v54_v15 = vmul.f32 %v53_v11, %v53_v11 }
  0xa6   :  { %v76_v16 = vpop.permute.xlu0 %75  ;;  %v147_v17 = vpop.permute.xlu1 %146 }
  0xa7   :  { %v82_v18 = vsub.f32 %v76_v16, %v81_v12  ;;  %v153_v19 = vsub.f32 %v147_v17, %v152_v13 }
  0xa9   :  { %v83_v23 = vmul.f32 %v82_v18, %v82_v18  ;;  %v154_v24 = vmul.f32 %v153_v19, %v153_v19  ;;  %v56_v18 = vmul.f32 %v501_v22, %v54_v15 }
  0xab   :  { %v112_v27 = vpop.permute.xlu0 %111  ;;  %v182_v28 = vpop.permute.xlu1 %181  ;;  %v84_v29 = vmul.f32 %v83_v23, %v501_v22  ;;  %v155_v34 = vmul.f32 %v154_v24, %v501_v22  ;;  %v58_v23 = vsel %vm57_vm1, %v56_v18, 0.0 }
  0xac   :  { %v118_v30 = vsub.f32 %v112_v27, %v117_v20  ;;  %v188_v31 = vsub.f32 %v182_v28, %v187_v21 }
  0xad   :  { %v86_v32 = vsel %vm85_vm0, %v84_v29, -inf  ;;  %v156_v42 = vsel %vm85_vm0, %v155_v34, -inf }
  0xae   :  { %v119_v36 = vmul.f32 %v118_v30, %v118_v30  ;;  %v189_v37 = vmul.f32 %v188_v31, %v188_v31  ;;  %87 = vmax.xlane.f32.xlu1 %v86_v32 }
  0xb0   :  { %v217_v38 = vpop.permute.xlu1 %216  ;;  %v120_v39 = vmul.f32 %v119_v36, %v501_v22  ;;  %v252_v40 = vpop.permute.xlu0 %251  ;;  %v190_v45 = vmul.f32 %v189_v37, %v501_v22 }
  0xb1   :  { %v223_v41 = vsub.f32 %v217_v38, %v222_v33  ;;  %v258_v43 = vsub.f32 %v252_v40, %v257_v35 }
  0xb2   :  { %157 = vmax.xlane.f32.xlu1 %v156_v42  ;;  %v121_v44 = vsel %vm85_vm0, %v120_v39, -inf  ;;  %v191_v50 = vsel %vm85_vm0, %v190_v45, -inf }
  0xb3   :  { %v224_v46 = vmul.f32 %v223_v41, %v223_v41  ;;  %122 = vmax.xlane.f32.xlu0 %v121_v44  ;;  %v259_v47 = vmul.f32 %v258_v43, %v258_v43 }
  0xb5   :  { %v225_v48 = vmul.f32 %v224_v46, %v501_v22  ;;  %v260_v49 = vmul.f32 %v259_v47, %v501_v22 }
  0xb7   :  { %192 = vmax.xlane.f32.xlu0 %v191_v50  ;;  %v226_v51 = vsel %vm85_vm0, %v225_v48, -inf  ;;  %v261_v52 = vsel %vm85_vm0, %v260_v49, -inf }
  0xb8   :  { %227 = vmax.xlane.f32.xlu1 %v226_v51 }
  0xbb   :  { %262 = vmax.xlane.f32.xlu0 %v261_v52 }
 0x13b   :  { %v515_v53 = vpop.xlane.xlu1 %87 }
 0x13c   :  { %v89_v54 = vsub.f32 %v84_v29, %v515_v53 }
 0x13e   :  { %v90_v55 = vmul.f32 1.442695, %v89_v54 }
 0x13f   :  { %v518_v56 = vpop.xlane.xlu1 %157 }
 0x140   :  { %333 = vpow2.f32 %v90_v55  ;;  %v159_v57 = vsub.f32 %v155_v34, %v518_v56  ;;  %v521_v58 = vpop.xlane.xlu0 %122 }
 0x141   :  { %v124_v59 = vsub.f32 %v120_v39, %v521_v58 }
 0x142   :  { %v160_v60 = vmul.f32 1.442695, %v159_v57 }
 0x143   :  { %v125_v61 = vmul.f32 1.442695, %v124_v59 }
 0x144   :  { %335 = vpow2.f32 %v160_v60  ;;  %v524_v62 = vpop.xlane.xlu0 %192 }
 0x145   :  { %337 = vpow2.f32 %v125_v61  ;;  %v194_v63 = vsub.f32 %v190_v45, %v524_v62  ;;  %v527_v0 = vpop.xlane.xlu1 %227 }
 0x146   :  { %v229_v1 = vsub.f32 %v225_v48, %v527_v0 }
 0x147   :  { %v195_v3 = vmul.f32 1.442695, %v194_v63 }
 0x148   :  { %v230_v4 = vmul.f32 1.442695, %v229_v1  ;;  %v530_v5 = vpop.xlane.xlu0 %262 }
 0x149   :  { %339 = vpow2.f32 %v195_v3  ;;  %v264_v7 = vsub.f32 %v260_v49, %v530_v5 }
 0x14a   :  { %v334_v8 = vpop.eup %333  ;;  %341 = vpow2.f32 %v230_v4 }
 0x14b   :  { %v265_v9 = vmul.f32 1.442695, %v264_v7  ;;  %v92_v10 = vsel %vm85_vm0, %v334_v8, 0.0 }
 0x14c   :  { %93 = vadd.xlane.f32.xlu1 %v92_v10 }
 0x14d   :  { %343 = vpow2.f32 %v265_v9 }
 0x14e   :  { %v336_v12 = vpop.eup %335 }
 0x14f   :  { %v338_v13 = vpop.eup %337  ;;  %v162_v14 = vsel %vm85_vm0, %v336_v12, 0.0 }
 0x150   :  { %163 = vadd.xlane.f32.xlu1 %v162_v14  ;;  %v127_v16 = vsel %vm85_vm0, %v338_v13, 0.0 }
 0x151   :  { %128 = vadd.xlane.f32.xlu0 %v127_v16 }
 0x153   :  { %v340_v17 = vpop.eup %339 }
 0x154   :  { %v342_v19 = vpop.eup %341  ;;  %v197_v20 = vsel %vm85_vm0, %v340_v17, 0.0 }
 0x155   :  { %198 = vadd.xlane.f32.xlu0 %v197_v20  ;;  %v232_v2 = vsel %vm85_vm0, %v342_v19, 0.0 }
 0x156   :  { %233 = vadd.xlane.f32.xlu1 %v232_v2 }
 0x157   :  { %v344_v21 = vpop.eup %343 }
 0x158   :  { %v267_v24 = vsel %vm85_vm0, %v344_v21, 0.0 }
 0x159   :  { %268 = vadd.xlane.f32.xlu0 %v267_v24 }
 0x15a   :  { %59 = vadd.xlane.f32.xlu1 %v58_v23 }
 0x1d9   :  { %v94_v25 = vpop.xlane.xlu1 %93 }
 0x1da   :  { %345 = vlog2.f32 %v94_v25 }
 0x1dd   :  { %v164_v26 = vpop.xlane.xlu1 %163 }
 0x1de   :  { %347 = vlog2.f32 %v164_v26  ;;  %v129_v27 = vpop.xlane.xlu0 %128 }
 0x1df   :  { %349 = vlog2.f32 %v129_v27 }
 0x1e2   :  { %v199_v22 = vpop.xlane.xlu0 %198 }
 0x1e3   :  { %351 = vlog2.f32 %v199_v22  ;;  %v234_v28 = vpop.xlane.xlu1 %233 }
 0x1e4   :  { %v346_v29 = vpop.eup %345  ;;  %353 = vlog2.f32 %v234_v28 }
 0x1e5   :  { %v96_v30 = vmul.f32 0.6931472, %v346_v29 }
 0x1e6   :  { %v269_v31 = vpop.xlane.xlu0 %268 }
 0x1e7   :  { %355 = vlog2.f32 %v269_v31  ;;  %v60_v32 = vpop.xlane.xlu1 %59  ;;  %v97_v33 = vadd.f32 %v96_v30, %v515_v53 }
 0x1e8   :  { %v348_v34 = vpop.eup %347  ;;  %v63_v35 = vsel %vm62_vm2, %v60_v32, 0.0 }
 0x1e9   :  { %v350_v36 = vpop.eup %349  ;;  %v166_v37 = vmul.f32 0.6931472, %v348_v34  ;;  %64 = vadd.xlane.f32.xlu0 %v63_v35  ;;  %v99_v38 = vsel %vm62_vm2, %v97_v33, 0.0 }
 0x1ea   :  { %v131_v39 = vmul.f32 0.6931472, %v350_v36  ;;  %100 = vadd.xlane.f32.xlu1 %v99_v38 }
 0x1eb   :  { %v167_v40 = vadd.f32 %v166_v37, %v518_v56 }
 0x1ec   :  { %v132_v41 = vadd.f32 %v131_v39, %v521_v58 }
 0x1ed   :  { %v352_v42 = vpop.eup %351  ;;  %v169_v43 = vsel %vm62_vm2, %v167_v40, 0.0 }
 0x1ee   :  { %v354_v44 = vpop.eup %353  ;;  %v201_v45 = vmul.f32 0.6931472, %v352_v42  ;;  %170 = vadd.xlane.f32.xlu1 %v169_v43  ;;  %v134_v46 = vsel %vm62_vm2, %v132_v41, 0.0 }
 0x1ef   :  { %v236_v47 = vmul.f32 0.6931472, %v354_v44  ;;  %135 = vadd.xlane.f32.xlu0 %v134_v46 }
 0x1f0   :  { %v202_v48 = vadd.f32 %v201_v45, %v524_v62 }
 0x1f1   :  { %v356_v49 = vpop.eup %355  ;;  %v237_v50 = vadd.f32 %v236_v47, %v527_v0 }
 0x1f2   :  { %v271_v51 = vmul.f32 0.6931472, %v356_v49  ;;  %v204_v52 = vsel %vm62_vm2, %v202_v48, 0.0 }
 0x1f3   :  { %205 = vadd.xlane.f32.xlu0 %v204_v52  ;;  %v239_v53 = vsel %vm62_vm2, %v237_v50, 0.0 }
 0x1f4   :  { %240 = vadd.xlane.f32.xlu1 %v239_v53  ;;  %v272_v54 = vadd.f32 %v271_v51, %v530_v5 }
 0x1f6   :  { %v274_v55 = vsel %vm62_vm2, %v272_v54, 0.0 }
 0x1f7   :  { %275 = vadd.xlane.f32.xlu0 %v274_v55 }
 0x276   :  { %v65_v56 = vpop.xlane.xlu0 %64 }
 0x277   :  { %v66_v57 = vrot.slane %v65_v56, 4  ;;  %v101_v58 = vpop.xlane.xlu1 %100 }
 0x278   :  { %v102_v59 = vrot.slane %v101_v58, 4 }
 0x279   :  { %v67_v60 = vadd.f32 %v66_v57, %v65_v56 }
 0x27a   :  { %v103_v61 = vadd.f32 %v102_v59, %v101_v58 }
 0x27b   :  { %v68_v62 = vrot.slane %v67_v60, 2  ;;  %v171_v63 = vpop.xlane.xlu1 %170 }
 0x27c   :  { %v104_v0 = vrot.slane %v103_v61, 2  ;;  %v172_v1 = vrot.slane %v171_v63, 4  ;;  %v136_v3 = vpop.xlane.xlu0 %135 }
 0x27d   :  { %v137_v4 = vrot.slane %v136_v3, 4  ;;  %v69_v6 = vadd.f32 %v68_v62, %v67_v60 }
 0x27e   :  { %v173_v7 = vadd.f32 %v172_v1, %v171_v63  ;;  %v105_v8 = vadd.f32 %v104_v0, %v103_v61 }
 0x27f   :  { %v138_v9 = vadd.f32 %v137_v4, %v136_v3  ;;  %v70_v5 = vrot.slane %v69_v6, 1 }
 0x280   :  { %v174_v10 = vrot.slane %v173_v7, 2  ;;  %v206_v11 = vpop.xlane.xlu0 %205  ;;  %v106_v12 = vrot.slane %v105_v8, 1 }
 0x281   :  { %v139_v13 = vrot.slane %v138_v9, 2  ;;  %v207_v14 = vrot.slane %v206_v11, 4  ;;  %v241_v15 = vpop.xlane.xlu1 %240  ;;  %v71_v16 = vadd.f32 %v70_v5, %v69_v6 }
 0x282   :  { %v242_v17 = vrot.slane %v241_v15, 4  ;;  %v107_v18 = vadd.f32 %v106_v12, %v105_v8  ;;  %v175_v19 = vadd.f32 %v174_v10, %v173_v7 }
 0x283   :  { %v208_v20 = vadd.f32 %v207_v14, %v206_v11  ;;  %304 = vpush %v71_v16  ;;  %v140_v2 = vadd.f32 %v139_v13, %v138_v9 }
 0x284   :  { %v243_v21 = vadd.f32 %v242_v17, %v241_v15  ;;  %v276_v23 = vpop.xlane.xlu0 %275  ;;  %306 = vpush %v107_v18  ;;  %v176_v24 = vrot.slane %v175_v19, 1 }
 0x285   :  { %v209_v25 = vrot.slane %v208_v20, 2  ;;  %v277_v26 = vrot.slane %v276_v23, 4  ;;  %v141_v27 = vrot.slane %v140_v2, 1 }
 0x286   :  { %v244_v22 = vrot.slane %v243_v21, 2  ;;  %v177_v28 = vadd.f32 %v176_v24, %v175_v19 }
 0x287   :  { %v278_v29 = vadd.f32 %v277_v26, %v276_v23  ;;  %v142_v30 = vadd.f32 %v141_v27, %v140_v2  ;;  %v210_v31 = vadd.f32 %v209_v25, %v208_v20 }
 0x288   :  { %v245_v32 = vadd.f32 %v244_v22, %v243_v21 }
 0x289   :  { %v279_v33 = vrot.slane %v278_v29, 2  ;;  %308 = vpush %v142_v30  ;;  %v211_v34 = vrot.slane %v210_v31, 1 }
 0x28a   :  { %310 = vpush %v177_v28  ;;  %v246_v35 = vrot.slane %v245_v32, 1 }
 0x28b   :  { %v280_v36 = vadd.f32 %v279_v33, %v278_v29  ;;  %v212_v37 = vadd.f32 %v211_v34, %v210_v31 }
 0x28c   :  { %v247_v38 = vadd.f32 %v246_v35, %v245_v32 }
 0x28d   :  { %312 = vpush %v212_v37  ;;  %v281_v39 = vrot.slane %v280_v36, 1 }
 0x28e   :  { %314 = vpush %v247_v38 }
 0x28f   :  { %v282_v40 = vadd.f32 %v281_v39, %v280_v36 }
 0x291   :  { %316 = vpush %v282_v40 }
 0x2b4   :  { %s305_s0 = spop %304 }
 0x2b5   :  { %s307_s3 = spop %306 }
 0x2ba   :  { %s309_s15 = spop %308 }
 0x2bb   :  { %s144_s16 = sadd.f32 %s309_s15, %s307_s3  ;;  %s311_s17 = spop %310 }
 0x2bd   :  { %s179_s18 = sadd.f32 %s311_s17, %s144_s16 }
 0x2be   :  { %s313_s19 = spop %312 }
 0x2bf   :  { %s214_s20 = sadd.f32 %s313_s19, %s179_s18  ;;  %s315_s21 = spop %314 }
 0x2c1   :  { %s249_s22 = sadd.f32 %s315_s21, %s214_s20 }
 0x2c2   :  { %s317_s23 = spop %316 }
 0x2c3   :  { %s284_s24 = sadd.f32 %s317_s23, %s249_s22 }
 0x2c5   :  { %s285_s27 = ssub.f32 %s284_s24, %s305_s0 }
 0x2c7   :  { %v286_v41 = vstv %s285_s27 }
 0x2c8   :  { %287 = vst [vmem:[#allocation8] sm:$0xff] %v286_v41 }
 0x2c9   :  { %412 = shalt.err (!%p409_p6)
}
 0x2ca   :  { %s413_s5 = scalar_lea.hbm %s570_s4, 128 }
 0x2cb   :  { %p414_p7 = scmp.ne.s32.totalorder %s570_s4, %s413_s5  ;;  %p417_p8 = scmp.lt.u32.totalorder %s413_s5, %s570_s4 }
 0x2cd   :  { %p419_p9 = pnand %p417_p8, %p414_p7 }
 0x2cf   :  { %422 = shalt.err (!%p419_p9)
}
 0x2d0   :  { %297 = dma.vmem_to_hbm [thread:$0]  %s295_s26, 128, %s570_s4, [#allocation5]  }
 0x2d1   :  { %427 = dma.done.wait [#allocation5], 128  }
 0x2d2   :  { %428 = vsyncadd [#allocation5], 4294967168 }
 0x2d3   :  { %301 = vsyncpa [#allocation4], 1 }
 0x2d4   :  { %302 = vsyncpa [#allocation7], 1 }
 0x2d5   :  { %303 = vsyncpa [#allocation5], 1 }

</bundles_post_ra>
